<compile_context>
chip_gen: v7x
topology: tpu7x:2x2x1
jax: 0.10.0
libtpu: 0.0.40
codegen_flags: <defaults>
</compile_context>

<pallas_src>
import jax
import jax.numpy as jnp
from jax.experimental import pallas as pl
from jax.experimental.pallas import tpu as pltpu

# logical problem sizes (nn.Linear(4, 4), batch of 2, demo sequence of 8 steps)
B, F = 2, 4
T = 8


def _linear_gate_tanh(x, wt, b, h):
    """tanh(dg(x @ W^T + b) + h) on (B, F) tiles; pure VPU (no MXU: K=F=4)."""
    # linear(x) via F unrolled FMAs; bias row seeds the accumulator.
    y = b + x[:, 0:1] * wt[0:1, :]
    for i in range(1, F):
        y = y + x[:, i:i + 1] * wt[i:i + 1, :]
    # MyDecisionGate: keep the reduction vector-shaped (no scalar round-trip).
    s = jnp.sum(y, axis=(0, 1), keepdims=True)          # (1, 1) on the XLU
    gated = jnp.where(s > 0.0, y, -y)
    return jnp.tanh(gated + h)


# ---------------- single step: exact MyCell.forward ----------------

def mycell_step_kernel(slab_ref, out_ref):
    # slab rows: [0:B)=x, [B:2B)=h, [2B:2B+F)=W^T, [2B+F]=bias  (static slices)
    x = slab_ref[0:B, :]
    h = slab_ref[B:2 * B, :]
    wt = slab_ref[2 * B:2 * B + F, :]
    b = slab_ref[2 * B + F:2 * B + F + 1, :]
    out_ref[...] = _linear_gate_tanh(x, wt, b, h)


@jax.jit
def mycell_forward(x, h, params):
    """x, h: (B, F); params: (F+1, F) = [W^T; bias]. Returns (new_h, new_h)."""
    slab = jnp.concatenate([x, h, params], axis=0)       # one coalesced input DMA
    rows = 2 * B + F + 1
    out = pl.pallas_call(
        mycell_step_kernel,
        out_shape=jax.ShapeDtypeStruct((B, F), jnp.float32),
        in_specs=[pl.BlockSpec((rows, F), lambda: (0, 0))],   # full-array block
        out_specs=pl.BlockSpec((B, F), lambda: (0, 0)),
    )(slab)
    return out, out


# -------- fused recurrent sequence: T applications of the cell, one call --------

def mycell_seq_kernel(params_ref, h0_ref, x_ref, hs_ref, hlast_ref, h_carry):
    t = pl.program_id(0)

    @pl.when(t == 0)
    def _():
        h_carry[...] = h0_ref[...]          # init carried hidden state

    x = x_ref[0]                            # (B, F) for this timestep
    wt = params_ref[0:F, :]                 # (F, F) = W^T   (resident in VMEM)
    b = params_ref[F:F + 1, :]              # (1, F) bias row

    new_h = _linear_gate_tanh(x, wt, b, h_carry[...])
    h_carry[...] = new_h
    hs_ref[...] = new_h[None, :, :]         # per-step output block

    @pl.when(t == pl.num_programs(0) - 1)
    def _():
        hlast_ref[...] = new_h              # final state (aliased back onto h0)


@jax.jit
def mycell_sequence(xs, h0, params):
    """Apply MyCell.forward over xs[t] sequentially in a single pallas_call.

    xs: (T, B, F), h0: (B, F), params: (F+1, F) = [W^T; bias].
    Returns (all per-step new_h (T, B, F), final new_h (B, F)).
    """
    nT = xs.shape[0]
    hs, h_last = pl.pallas_call(
        mycell_seq_kernel,
        grid=(nT,),
        out_shape=(jax.ShapeDtypeStruct((nT, B, F), jnp.float32),
                   jax.ShapeDtypeStruct((B, F), jnp.float32)),
        in_specs=[
            pl.BlockSpec((F + 1, F), lambda t: (0, 0)),      # W^T+bias, resident
            pl.BlockSpec((B, F), lambda t: (0, 0)),          # h0, resident
            pl.BlockSpec((1, B, F), lambda t: (t, 0, 0)),    # x_t, streamed per step
        ],
        out_specs=[
            pl.BlockSpec((1, B, F), lambda t: (t, 0, 0)),    # new_h per step
            pl.BlockSpec((B, F), lambda t: (0, 0)),          # final carried state
        ],
        scratch_shapes=[pltpu.VMEM((B, F), jnp.float32)],    # carried hidden state
        input_output_aliases={1: 1},                         # h written back in place
        compiler_params=pltpu.CompilerParams(
            dimension_semantics=("arbitrary",)),             # recurrence -> sequential
    )(params, h0, xs)
    # TODO(synk): for large T, emit new_h lane-dense (time on the lane axis,
    # padded to a multiple of 128, single end-of-grid writeback) and, when
    # batching independent sequences, put batch on the lane axis (>=128 wide)
    # with a leading "parallel" grid axis so v7x's second TensorCore is used;
    # with B=2, F=4 from the module spec there is no lane-dense data to lay out.
    return hs, h_last


if __name__ == "__main__":
    key = jax.random.PRNGKey(0)
    kw, kb, kx, kh, ks, kh0 = jax.random.split(key, 6)

    # Deterministic "parameters" mimicking nn.Linear(4, 4) init (U[-1/sqrt(F), 1/sqrt(F)]).
    bound = 1.0 / (F ** 0.5)
    weight = jax.random.uniform(kw, (F, F), jnp.float32, -bound, bound)   # (out, in)
    bias = jax.random.uniform(kb, (F,), jnp.float32, -bound, bound)

    # One-time parameter prep (hoisted out of the forward path):
    # bias folded into W^T as an extra row -> one parameter slab, one DMA.
    params = jnp.concatenate([weight.T, bias[None, :]], axis=0)           # (F+1, F)

    # Example inputs consistent with the module's forward.
    x = jax.random.normal(kx, (B, F), jnp.float32)
    h = jax.random.normal(kh, (B, F), jnp.float32)
    xs = jax.random.normal(ks, (T, B, F), jnp.float32)    # sequence for the fused demo
    h0 = jax.random.normal(kh0, (B, F), jnp.float32)

    # Pure-JAX reference of the exact PyTorch semantics.
    def ref_step(x_, h_):
        y = x_ @ weight.T + bias
        gated = jnp.where(jnp.sum(y) > 0.0, y, -y)
        return jnp.tanh(gated + h_)

    ref_new_h = ref_step(x, h)
    ref_hs = []
    hh = h0
    for t in range(T):
        hh = ref_step(xs[t], hh)
        ref_hs.append(hh)
    ref_hs = jnp.stack(ref_hs, axis=0)

    # Single step (module forward) and fused T-step recurrence (one pallas_call).
    new_h, new_h_again = mycell_forward(x, h, params)
    hs, h_last = mycell_sequence(xs, h0, params)
    jax.block_until_ready((new_h, hs, h_last))

    assert jnp.allclose(new_h, ref_new_h, atol=1e-5), "single-step mismatch"
    assert jnp.array_equal(new_h, new_h_again)
    assert jnp.allclose(hs, ref_hs, atol=1e-5), "fused-sequence mismatch"
    assert jnp.allclose(h_last, ref_hs[-1], atol=1e-5), "final-state mismatch"

    print("KERNEL_OK")
</pallas_src>

<mosaic_0001>
module attributes {stable_mosaic.version = 11 : i64} {
  func.func @mycell_step_kernel(%arg0: memref<9x4xf32, #tpu.memory_space<vmem>>, %arg1: memref<2x4xf32, #tpu.memory_space<vmem>>) attributes {dimension_semantics = [], scalar_prefetch = 0 : i64, scratch_operands = 0 : i64, tpu.core_type = #tpu.core_type<tc>} {
    %c0 = arith.constant 0 : index
    %c0_0 = arith.constant 0 : index
    %0 = vector.load %arg0[%c0, %c0_0] : memref<9x4xf32, #tpu.memory_space<vmem>>, vector<2x4xf32>
    %c2 = arith.constant 2 : index
    %c0_1 = arith.constant 0 : index
    %1 = vector.load %arg0[%c2, %c0_1] : memref<9x4xf32, #tpu.memory_space<vmem>>, vector<2x4xf32>
    %c4 = arith.constant 4 : index
    %c0_2 = arith.constant 0 : index
    %2 = vector.load %arg0[%c4, %c0_2] : memref<9x4xf32, #tpu.memory_space<vmem>>, vector<4x4xf32>
    %c8 = arith.constant 8 : index
    %c0_3 = arith.constant 0 : index
    %3 = vector.load %arg0[%c8, %c0_3] : memref<9x4xf32, #tpu.memory_space<vmem>>, vector<1x4xf32>
    %4 = vector.extract_strided_slice %0 {offsets = [0, 0], sizes = [2, 1], strides = [1, 1]} : vector<2x4xf32> to vector<2x1xf32>
    %5 = vector.extract_strided_slice %2 {offsets = [0, 0], sizes = [1, 4], strides = [1, 1]} : vector<4x4xf32> to vector<1x4xf32>
    %6 = vector.broadcast %4 : vector<2x1xf32> to vector<2x4xf32>
    %7 = vector.broadcast %5 : vector<1x4xf32> to vector<2x4xf32>
    %8 = arith.mulf %6, %7 : vector<2x4xf32>
    %9 = vector.broadcast %3 : vector<1x4xf32> to vector<2x4xf32>
    %10 = arith.addf %9, %8 : vector<2x4xf32>
    %11 = vector.extract_strided_slice %0 {offsets = [0, 1], sizes = [2, 1], strides = [1, 1]} : vector<2x4xf32> to vector<2x1xf32>
    %12 = vector.extract_strided_slice %2 {offsets = [1, 0], sizes = [1, 4], strides = [1, 1]} : vector<4x4xf32> to vector<1x4xf32>
    %13 = vector.broadcast %11 : vector<2x1xf32> to vector<2x4xf32>
    %14 = vector.broadcast %12 : vector<1x4xf32> to vector<2x4xf32>
    %15 = arith.mulf %13, %14 : vector<2x4xf32>
    %16 = arith.addf %10, %15 : vector<2x4xf32>
    %17 = vector.extract_strided_slice %0 {offsets = [0, 2], sizes = [2, 1], strides = [1, 1]} : vector<2x4xf32> to vector<2x1xf32>
    %18 = vector.extract_strided_slice %2 {offsets = [2, 0], sizes = [1, 4], strides = [1, 1]} : vector<4x4xf32> to vector<1x4xf32>
    %19 = vector.broadcast %17 : vector<2x1xf32> to vector<2x4xf32>
    %20 = vector.broadcast %18 : vector<1x4xf32> to vector<2x4xf32>
    %21 = arith.mulf %19, %20 : vector<2x4xf32>
    %22 = arith.addf %16, %21 : vector<2x4xf32>
    %23 = vector.extract_strided_slice %0 {offsets = [0, 3], sizes = [2, 1], strides = [1, 1]} : vector<2x4xf32> to vector<2x1xf32>
    %24 = vector.extract_strided_slice %2 {offsets = [3, 0], sizes = [1, 4], strides = [1, 1]} : vector<4x4xf32> to vector<1x4xf32>
    %25 = vector.broadcast %23 : vector<2x1xf32> to vector<2x4xf32>
    %26 = vector.broadcast %24 : vector<1x4xf32> to vector<2x4xf32>
    %27 = arith.mulf %25, %26 : vector<2x4xf32>
    %28 = arith.addf %22, %27 : vector<2x4xf32>
    %29 = vector.shape_cast %28 : vector<2x4xf32> to vector<1x2x4xf32>
    %cst = arith.constant dense<0.000000e+00> : vector<1xf32>
    %30 = vector.multi_reduction <add>, %29, %cst [1, 2] : vector<1x2x4xf32> to vector<1xf32>
    %31 = vector.shape_cast %30 : vector<1xf32> to vector<1x1x1xf32>
    %32 = vector.extract %31[0, 0, 0] : f32 from vector<1x1x1xf32>
    %33 = vector.broadcast %32 : f32 to vector<1x1xf32>
    %cst_4 = arith.constant 0.000000e+00 : f32
    %34 = vector.broadcast %cst_4 : f32 to vector<1x1xf32>
    %35 = arith.cmpf ogt, %33, %34 : vector<1x1xf32>
    %cst_5 = arith.constant 0.000000e+00 : f32
    %36 = vector.broadcast %cst_5 : f32 to vector<2x4xf32>
    %37 = arith.subf %36, %28 : vector<2x4xf32>
    %38 = vector.shape_cast %35 : vector<1x1xi1> to vector<1x1xi1>
    %39 = vector.broadcast %38 : vector<1x1xi1> to vector<2x4xi1>
    %40 = arith.select %39, %28, %37 : vector<2x4xi1>, vector<2x4xf32>
    %41 = arith.addf %40, %1 : vector<2x4xf32>
    %42 = math.tanh %41 : vector<2x4xf32>
    %c0_6 = arith.constant 0 : index
    %c0_7 = arith.constant 0 : index
    %43 = vector.load %arg1[%c0_6, %c0_7] : memref<2x4xf32, #tpu.memory_space<vmem>>, vector<2x4xf32>
    tpu.vector_store %arg1[%c0_6, %c0_7], %42 {strides = array<i32>} : memref<2x4xf32, #tpu.memory_space<vmem>>, vector<2x4xf32>,
    return
  }
}

</mosaic_0001>

<bundles_post_ra>
// kernel: mycell_forward.1
= control target key start
LH: loop header
LB: loop body
LE: loop exit
PB: predicated region body
PF: predicated region fallthrough
CT: control target
= control target key end

     0   :  { %v95_v0 = vmov 0   ;;  %v96_v2 = vmov 2   ;;  %v97_v3 = vmov 1   ;;  %v98_v4 = vmov 3   ;;  %s126_s0 = inlined_call_operand.vmem [shape: f32[9,4], index: 0, kind: input, shape index: {}]   ;;  %s127_s1 = inlined_call_operand.vmem [shape: f32[2,4], index: 1, kind: output, shape index: {}]  }
   0x1   :  { %88 = vset.pattern.permute.xlu0 %v95_v0  ;;  %v8_v1 = vld [vmem:[%s126_s0] sm:$0x3]  ;;  %90 = vset.pattern.permute.xlu1 %v96_v2  ;;  %v17_v5 = vlaneseq  ;;  %v10_v8 = vld [vmem:[%s126_s0 + $0x4] sm:$0xf]  ;;  %v81_v17 = vld [vmem:[%s126_s0 + $0x8] ss:$0 sm:$0xff] }
   0x2   :  { %14 = vperm.xlu0 %88, %v8_v1   ;;  %38 = vperm.xlu1 %90, %v8_v1   ;;  %vm57_vm0 = vcmask 25600   ;;  %v9_v37 = vld [vmem:[%s126_s0 + $0x2] sm:$0x3] }
   0x3   :  { %v18_v6 = vshrl.u32 %v17_v5, 7 }
   0x5   :  { %v19_v7 = vsub.s32 0, %v18_v6  ;;  %v33_v10 = vsub.s32 1, %v18_v6  ;;  %v43_v12 = vsub.s32 2, %v18_v6  ;;  %v53_v14 = vsub.s32 3, %v18_v6 }
   0x6   :  { %89 = vset.pattern.permute.xlu0 %v97_v3  ;;  %91 = vset.pattern.permute.xlu1 %v98_v4 }
   0x7   :  { %28 = vperm.xlu0 %89, %v8_v1   ;;  %48 = vperm.xlu1 %91, %v8_v1   ;;  %v20_v9 = vrot.slane %v10_v8, %v19_v7  ;;  %v34_v16 = vrot.slane %v10_v8, %v33_v10  ;;  %v44_v18 = vrot.slane %v10_v8, %v43_v12 }
   0x8   :  { %v54_v19 = vrot.slane %v10_v8, %v53_v14 }
   0xb   :  { %92 = vset.pattern.permute.xlu0 %v98_v4 }
  0x81   :  { %v15_v11 = vpop.permute.xlu0 %14  ;;  %v39_v13 = vpop.permute.xlu1 %38 }
  0x82   :  { %v21_v15 = vmul.f32 %v20_v9, %v15_v11  ;;  %v45_v24 = vmul.f32 %v44_v18, %v39_v13 }
  0x84   :  { %v26_v22 = vadd.f32 %v81_v17, %v21_v15 }
  0x86   :  { %v29_v20 = vpop.permute.xlu0 %28  ;;  %v49_v21 = vpop.permute.xlu1 %48 }
  0x87   :  { %v35_v23 = vmul.f32 %v34_v16, %v29_v20  ;;  %v55_v26 = vmul.f32 %v54_v19, %v49_v21 }
  0x89   :  { %v36_v25 = vadd.f32 %v35_v23, %v26_v22 }
  0x8b   :  { %v46_v27 = vadd.f32 %v45_v24, %v36_v25 }
  0x8d   :  { %v56_v28 = vadd.f32 %v55_v26, %v46_v27 }
  0x8f   :  { %v58_v29 = vsel %vm57_vm0, %v56_v28, 0.0  ;;  %v70_v39 = vsub.f32 0.0, %v56_v28 }
  0x90   :  { %59 = vadd.xlane.f32.xlu1 %v58_v29 }
 0x11d   :  { %v60_v30 = vpop.xlane.xlu1 %59 }
 0x11e   :  { %v61_v31 = vrot.slane %v60_v30, 4 }
 0x120   :  { %v62_v32 = vadd.f32 %v61_v31, %v60_v30 }
 0x122   :  { %v63_v33 = vrot.slane %v62_v32, 2 }
 0x124   :  { %v64_v34 = vadd.f32 %v63_v33, %v62_v32 }
 0x126   :  { %v65_v35 = vrot.slane %v64_v34, 1 }
 0x128   :  { %v66_v36 = vadd.f32 %v65_v35, %v64_v34 }
 0x12a   :  { %82 = vpush %v66_v36 }
 0x15b   :  { %s83_s12 = spop %82 }
 0x15c   :  { %v68_v38 = vstv %s83_s12 }
 0x15d   :  { %vm69_vm1 = vcmp.gt.f32.partialorder %v68_v38, 0.0 }
 0x15e   :  { %v73_v40 = vsel %vm69_vm1, %v56_v28, %v70_v39 }
 0x15f   :  { %v74_v41 = vadd.f32 %v73_v40, %v9_v37 }
 0x161   :  { %93 = vtanh.f32 %v74_v41 }
 0x16b   :  { %v94_v42 = vpop.eup %93 }
 0x16c   :  { %76 = vst.msk [vmem:[%s127_s1] sm:$0x3] %vm57_vm0, %v94_v42 }

</bundles_post_ra>
